<compile_context>
chip_gen: v6e
topology: v6e:2x2x1
jax: 0.10.0
libtpu: 0.0.40
codegen_flags: <defaults>
</compile_context>

<pallas_src>
import jax
import jax.numpy as jnp
from jax.experimental import pallas as pl
from jax.experimental.pallas import tpu as pltpu


def _round_up(x, m):
    return (x + m - 1) // m * m


def _pick_tiling(N, c_in_pp, c_mid_max, c_last, *, in_itemsize, out_itemsize,
                 max_tile_n, vmem_budget_bytes):
    """Pick (tile_n, padded_N).  Pads at most to the next multiple of 128."""
    # Rough per-point VMEM working set: double-buffered I/O blocks + intermediates.
    bpp = 2 * in_itemsize * max(c_in_pp, 1)        # pipelined per-point inputs
    bpp += 2 * out_itemsize * max(c_last, 1)       # pipelined output block
    bpp += 6 * max(c_mid_max, 1)                   # f32 accumulator + bf16 activations
    cap = (vmem_budget_bytes // bpp) // 128 * 128
    cap = max(128, min(max_tile_n, cap))
    if N <= cap:
        return N, N                                # one full-extent point tile, no padding
    n_pad = _round_up(N, 128)
    tile = 128
    for m in range(1, n_pad // 128 + 1):           # largest 128-multiple divisor <= cap
        t = 128 * m
        if t <= cap and n_pad % t == 0:
            tile = t
    return tile, n_pad


def make_folding_kernel(num_hidden, fold_codeword, compute_dtype):
    """Channels on sublanes, points on lanes.

    Ref order (fold_codeword=False):
      grids, codewords, W0_g, W0_c, shift0, [W_i, shift_i]*, W_out, b_out, out
    Ref order (fold_codeword=True):
      grids, shift0_b, W0_g, [W_i, shift_i]*, W_out, b_out, out
    All shifts/biases are f32; weights are compute_dtype (BN scale pre-folded).
    """

    def kernel(*refs):
        out_ref = refs[-1]
        idx = 0
        g = refs[idx][...].astype(compute_dtype)           # (Cg, tile_n), cast in-kernel
        idx += 1

        if fold_codeword:
            shift0 = refs[idx][...]                        # (oc0, 1) f32, per-batch
            idx += 1
            w_g = refs[idx][...]                           # (oc0, Cg)
            idx += 1
            y = jnp.dot(w_g, g, preferred_element_type=jnp.float32) + shift0
        else:
            c = refs[idx][...].astype(compute_dtype)       # (Cc, tile_n)
            idx += 1
            w_g = refs[idx][...]                           # (oc0, Cg)
            w_c = refs[idx + 1][...]                       # (oc0, Cc)
            shift0 = refs[idx + 2][...]                    # (oc0, 1) f32
            idx += 3
            y = (jnp.dot(w_g, g, preferred_element_type=jnp.float32)
                 + jnp.dot(w_c, c, preferred_element_type=jnp.float32)
                 + shift0)

        if num_hidden >= 1:
            # Layer 0 was a hidden (conv+BN+ReLU) layer.
            h = jnp.maximum(y, 0.0).astype(compute_dtype)
            for _ in range(num_hidden - 1):
                w = refs[idx][...]
                shift = refs[idx + 1][...]
                idx += 2
                y = jnp.dot(w, h, preferred_element_type=jnp.float32) + shift
                h = jnp.maximum(y, 0.0).astype(compute_dtype)
            w_out = refs[idx][...]
            b_out = refs[idx + 1][...]
            y = jnp.dot(w_out, h, preferred_element_type=jnp.float32) + b_out

        out_ref[...] = y.astype(out_ref.dtype)

    return kernel


def init_folding_params(key, in_channel, out_channels):
    """Deterministic parameters mirroring the module's __init__ shapes."""
    params = {"hidden": [], "out": None}
    ic = in_channel
    keys = jax.random.split(key, 2 * len(out_channels))
    for li, oc in enumerate(out_channels[:-1]):
        kw, kb = keys[2 * li], keys[2 * li + 1]
        w = jax.random.normal(kw, (oc, ic), jnp.float32) * 0.1
        b = jax.random.normal(kb, (oc,), jnp.float32) * 0.1
        gamma = 1.0 + 0.05 * jnp.arange(oc, dtype=jnp.float32)
        beta = 0.01 * jnp.arange(oc, dtype=jnp.float32)
        running_mean = 0.02 * jnp.arange(oc, dtype=jnp.float32)
        running_var = 1.0 + 0.03 * jnp.arange(oc, dtype=jnp.float32)
        params["hidden"].append((w, b, gamma, beta, running_mean, running_var))
        ic = oc
    oc = out_channels[-1]
    kw, kb = keys[-2], keys[-1]
    params["out"] = (jax.random.normal(kw, (oc, ic), jnp.float32) * 0.1,
                     jax.random.normal(kb, (oc,), jnp.float32) * 0.1)
    return params


def folding_layer_forward(grids, codewords, params, *, max_tile_n=8192, eps=1e-5,
                          compute_dtype=jnp.bfloat16, out_dtype=jnp.float32,
                          vmem_limit_bytes=32 * 1024 * 1024):
    """grids: (B, Cg, N).  codewords: (B, Cc, N) (general, torch semantics) or
    (B, Cc) (point-invariant FoldingNet codeword, folded into a per-batch shift).
    Returns (B, out_channels[-1], N) in out_dtype."""
    B, Cg, N = grids.shape
    fold_codeword = codewords.ndim == 2
    Cc = codewords.shape[1]
    if not fold_codeword:
        assert codewords.shape == (B, Cc, N), codewords.shape
    num_hidden = len(params["hidden"])

    # --- constant folding (f32): conv bias + eval-mode BN -> (W_folded, shift)
    folded = []
    for (w, b, gamma, beta, rmean, rvar) in params["hidden"]:
        inv_std = gamma / jnp.sqrt(rvar + eps)
        folded.append((w * inv_std[:, None],
                       ((b - rmean) * inv_std + beta).reshape(-1, 1)))
    w_out, b_out = params["out"]
    b_out_r = b_out.reshape(-1, 1)
    C_last = w_out.shape[0]

    # Layer 0 acts on cat([grids, codewords], dim=1); split its weight per input.
    w0, s0 = folded[0] if num_hidden >= 1 else (w_out, b_out_r)
    w0_g, w0_c = w0[:, :Cg], w0[:, Cg:]

    # --- point-axis tiling (pad at most to a multiple of 128, only if tiling requires)
    c_mid_max = max([f[0].shape[0] for f in folded] + [C_last])
    c_in_pp = Cg + (0 if fold_codeword else Cc)
    tile_n, n_pad = _pick_tiling(
        N, c_in_pp, c_mid_max, C_last,
        in_itemsize=grids.dtype.itemsize,
        out_itemsize=jnp.dtype(out_dtype).itemsize,
        max_tile_n=max_tile_n,
        vmem_budget_bytes=vmem_limit_bytes // 2)

    grids_k = grids if n_pad == N else jnp.pad(grids, ((0, 0), (0, 0), (0, n_pad - N)))

    kernel_args = [grids_k]
    in_specs = [pl.BlockSpec((None, Cg, tile_n), lambda b, j: (b, 0, j))]

    if fold_codeword:
        # Fold W0[:, Cg:] @ code_b into the per-batch layer-0 shift (f32, tiny).
        shift0_b = (jnp.einsum("oc,bc->bo", w0_c, codewords.astype(jnp.float32))
                    + s0[:, 0][None, :])[:, :, None]                  # (B, oc0, 1)
        w0_g_c = w0_g.astype(compute_dtype)
        kernel_args += [shift0_b, w0_g_c]
        in_specs += [
            pl.BlockSpec((None, shift0_b.shape[1], 1), lambda b, j: (b, 0, 0)),
            pl.BlockSpec(w0_g_c.shape, lambda b, j: (0, 0)),
        ]
    else:
        cw_k = codewords if n_pad == N else jnp.pad(
            codewords, ((0, 0), (0, 0), (0, n_pad - N)))
        w0_g_c = w0_g.astype(compute_dtype)
        w0_c_c = w0_c.astype(compute_dtype)
        kernel_args += [cw_k, w0_g_c, w0_c_c, s0]
        in_specs += [
            pl.BlockSpec((None, Cc, tile_n), lambda b, j: (b, 0, j)),
            pl.BlockSpec(w0_g_c.shape, lambda b, j: (0, 0)),
            pl.BlockSpec(w0_c_c.shape, lambda b, j: (0, 0)),
            pl.BlockSpec(s0.shape, lambda b, j: (0, 0)),
        ]

    if num_hidden >= 1:
        for (w_f, s) in folded[1:]:
            w_f_c = w_f.astype(compute_dtype)
            kernel_args += [w_f_c, s]
            in_specs += [pl.BlockSpec(w_f_c.shape, lambda b, j: (0, 0)),
                         pl.BlockSpec(s.shape, lambda b, j: (0, 0))]
        w_out_c = w_out.astype(compute_dtype)
        kernel_args += [w_out_c, b_out_r]
        in_specs += [pl.BlockSpec(w_out_c.shape, lambda b, j: (0, 0)),
                     pl.BlockSpec(b_out_r.shape, lambda b, j: (0, 0))]

    grid = (B, n_pad // tile_n)
    out = pl.pallas_call(
        make_folding_kernel(num_hidden, fold_codeword, compute_dtype),
        out_shape=jax.ShapeDtypeStruct((B, C_last, n_pad), out_dtype),
        grid_spec=pltpu.PrefetchScalarGridSpec(
            num_scalar_prefetch=0,
            grid=grid,
            in_specs=in_specs,
            out_specs=pl.BlockSpec((None, C_last, tile_n), lambda b, j: (b, 0, j)),
        ),
        compiler_params=pltpu.CompilerParams(
            dimension_semantics=("parallel", "parallel"),
            vmem_limit_bytes=vmem_limit_bytes),
    )(*kernel_args)

    return out if n_pad == N else out[:, :, :N]


def folding_layer_reference(grids, codewords, params, eps=1e-5):
    """Pure-JAX f32 reference of the PyTorch forward (eval-mode BatchNorm)."""
    if codewords.ndim == 2:
        codewords = jnp.broadcast_to(codewords[:, :, None],
                                     codewords.shape + (grids.shape[-1],))
    x = jnp.concatenate([grids, codewords], axis=1)
    for (w, b, gamma, beta, rmean, rvar) in params["hidden"]:
        x = jnp.einsum("oc,bcn->bon", w, x) + b[None, :, None]
        x = (x - rmean[None, :, None]) / jnp.sqrt(rvar[None, :, None] + eps)
        x = x * gamma[None, :, None] + beta[None, :, None]
        x = jnp.maximum(x, 0.0)
    w_out, b_out = params["out"]
    return jnp.einsum("oc,bcn->bon", w_out, x) + b_out[None, :, None]


if __name__ == "__main__":
    key = jax.random.PRNGKey(0)
    k_grid, k_code, k_params = jax.random.split(key, 3)

    # Small FoldingNet-style config: 2D grid channels + codeword channels.
    B, N = 2, 600                          # N not a multiple of 128
    C_grid, C_code = 2, 30
    in_channel = C_grid + C_code           # 32
    out_channels = [32, 32, 3]             # two hidden (conv+bn+relu) + output conv

    grids = jax.random.normal(k_grid, (B, C_grid, N), jnp.float32)
    code = jax.random.normal(k_code, (B, C_code), jnp.float32)          # point-invariant codeword
    codewords = jnp.broadcast_to(code[:, :, None], (B, C_code, N))      # what the torch module sees

    params = init_folding_params(k_params, in_channel, out_channels)
    ref = folding_layer_reference(grids, codewords, params)

    # 1) General path: per-point codewords, single full-extent point tile (no padding).
    out_pp = jax.block_until_ready(folding_layer_forward(grids, codewords, params))
    # 2) Folded path: codeword contribution folded into a per-batch layer-0 shift.
    out_fold = jax.block_until_ready(folding_layer_forward(grids, code, params))
    # 3) Tiled path: force tile_n=128 -> 128-padded N, multi-tile grid, output sliced to N.
    out_tiled = jax.block_until_ready(
        folding_layer_forward(grids, codewords, params, max_tile_n=256))

    assert out_pp.shape == (B, out_channels[-1], N), out_pp.shape
    # bf16 matmul operands (f32 accumulation) vs f32 reference -> loose tolerance.
    for o in (out_pp, out_fold, out_tiled):
        assert o.shape == ref.shape, (o.shape, ref.shape)
        assert jnp.allclose(o, ref, atol=5e-2, rtol=5e-2), \
            float(jnp.max(jnp.abs(o - ref)))

    print("KERNEL_OK")
</pallas_src>

<mosaic_0001>
module attributes {stable_mosaic.version = 11 : i64} {
  func.func @kernel(%arg0: i32, %arg1: i32, %arg2: memref<1x2x600xf32, #tpu.memory_space<vmem>>, %arg3: memref<1x30x600xf32, #tpu.memory_space<vmem>>, %arg4: memref<32x2xbf16, #tpu.memory_space<vmem>>, %arg5: memref<32x30xbf16, #tpu.memory_space<vmem>>, %arg6: memref<32x1xf32, #tpu.memory_space<vmem>>, %arg7: memref<32x32xbf16, #tpu.memory_space<vmem>>, %arg8: memref<32x1xf32, #tpu.memory_space<vmem>>, %arg9: memref<3x32xbf16, #tpu.memory_space<vmem>>, %arg10: memref<3x1xf32, #tpu.memory_space<vmem>>, %arg11: memref<1x3x600xf32, #tpu.memory_space<vmem>>) attributes {dimension_semantics = [#tpu.dimension_semantics<parallel>, #tpu.dimension_semantics<parallel>], iteration_bounds = array<i64: 2, 1>, scalar_prefetch = 0 : i64, scratch_operands = 0 : i64, tpu.core_type = #tpu.core_type<tc>, window_params = [{transform_indices = @transform_0, window_bounds = array<i64: 1, 2, 600>}, {transform_indices = @transform_1, window_bounds = array<i64: 1, 30, 600>}, {pipeline_mode = #tpu.pipeline_mode<synchronous>, transform_indices = @transform_2, window_bounds = array<i64: 32, 2>}, {pipeline_mode = #tpu.pipeline_mode<synchronous>, transform_indices = @transform_3, window_bounds = array<i64: 32, 30>}, {pipeline_mode = #tpu.pipeline_mode<synchronous>, transform_indices = @transform_4, window_bounds = array<i64: 32, 1>}, {pipeline_mode = #tpu.pipeline_mode<synchronous>, transform_indices = @transform_5, window_bounds = array<i64: 32, 32>}, {pipeline_mode = #tpu.pipeline_mode<synchronous>, transform_indices = @transform_6, window_bounds = array<i64: 32, 1>}, {pipeline_mode = #tpu.pipeline_mode<synchronous>, transform_indices = @transform_7, window_bounds = array<i64: 3, 32>}, {pipeline_mode = #tpu.pipeline_mode<synchronous>, transform_indices = @transform_8, window_bounds = array<i64: 3, 1>}, {transform_indices = @transform_9, window_bounds = array<i64: 1, 3, 600>}]} {
    %c0 = arith.constant 0 : index
    %c0_0 = arith.constant 0 : index
    %c0_1 = arith.constant 0 : index
    %0 = vector.load %arg2[%c0, %c0_0, %c0_1] : memref<1x2x600xf32, #tpu.memory_space<vmem>>, vector<1x2x600xf32>
    %1 = vector.shape_cast %0 : vector<1x2x600xf32> to vector<2x600xf32>
    %2 = arith.truncf %1 : vector<2x600xf32> to vector<2x600xbf16>
    %c0_2 = arith.constant 0 : index
    %c0_3 = arith.constant 0 : index
    %c0_4 = arith.constant 0 : index
    %3 = vector.load %arg3[%c0_2, %c0_3, %c0_4] : memref<1x30x600xf32, #tpu.memory_space<vmem>>, vector<1x30x600xf32>
    %4 = vector.shape_cast %3 : vector<1x30x600xf32> to vector<30x600xf32>
    %5 = arith.truncf %4 : vector<30x600xf32> to vector<30x600xbf16>
    %c0_5 = arith.constant 0 : index
    %c0_6 = arith.constant 0 : index
    %6 = vector.load %arg4[%c0_5, %c0_6] : memref<32x2xbf16, #tpu.memory_space<vmem>>, vector<32x2xbf16>
    %c0_7 = arith.constant 0 : index
    %c0_8 = arith.constant 0 : index
    %7 = vector.load %arg5[%c0_7, %c0_8] : memref<32x30xbf16, #tpu.memory_space<vmem>>, vector<32x30xbf16>
    %c0_9 = arith.constant 0 : index
    %c0_10 = arith.constant 0 : index
    %8 = vector.load %arg6[%c0_9, %c0_10] : memref<32x1xf32, #tpu.memory_space<vmem>>, vector<32x1xf32>
    %cst = arith.constant dense<0.000000e+00> : vector<32x600xf32>
    %9 = tpu.matmul %6, %2, %cst {dimension_numbers = #tpu.dot_dimension_numbers<[1], [0], [0], [1], [0, 0, 1, 1], [], []>} : vector<32x2xbf16>, vector<2x600xbf16>, vector<32x600xf32> -> vector<32x600xf32>
    %cst_11 = arith.constant dense<0.000000e+00> : vector<32x600xf32>
    %10 = tpu.matmul %7, %5, %cst_11 {dimension_numbers = #tpu.dot_dimension_numbers<[1], [0], [0], [1], [0, 0, 1, 1], [], []>} : vector<32x30xbf16>, vector<30x600xbf16>, vector<32x600xf32> -> vector<32x600xf32>
    %11 = arith.addf %9, %10 : vector<32x600xf32>
    %12 = vector.broadcast %8 : vector<32x1xf32> to vector<32x600xf32>
    %13 = arith.addf %11, %12 : vector<32x600xf32>
    %cst_12 = arith.constant 0.000000e+00 : f32
    %14 = vector.broadcast %cst_12 : f32 to vector<32x600xf32>
    %15 = arith.maximumf %13, %14 : vector<32x600xf32>
    %16 = arith.truncf %15 : vector<32x600xf32> to vector<32x600xbf16>
    %c0_13 = arith.constant 0 : index
    %c0_14 = arith.constant 0 : index
    %17 = vector.load %arg7[%c0_13, %c0_14] : memref<32x32xbf16, #tpu.memory_space<vmem>>, vector<32x32xbf16>
    %c0_15 = arith.constant 0 : index
    %c0_16 = arith.constant 0 : index
    %18 = vector.load %arg8[%c0_15, %c0_16] : memref<32x1xf32, #tpu.memory_space<vmem>>, vector<32x1xf32>
    %cst_17 = arith.constant dense<0.000000e+00> : vector<32x600xf32>
    %19 = tpu.matmul %17, %16, %cst_17 {dimension_numbers = #tpu.dot_dimension_numbers<[1], [0], [0], [1], [0, 0, 1, 1], [], []>} : vector<32x32xbf16>, vector<32x600xbf16>, vector<32x600xf32> -> vector<32x600xf32>
    %20 = vector.broadcast %18 : vector<32x1xf32> to vector<32x600xf32>
    %21 = arith.addf %19, %20 : vector<32x600xf32>
    %cst_18 = arith.constant 0.000000e+00 : f32
    %22 = vector.broadcast %cst_18 : f32 to vector<32x600xf32>
    %23 = arith.maximumf %21, %22 : vector<32x600xf32>
    %24 = arith.truncf %23 : vector<32x600xf32> to vector<32x600xbf16>
    %c0_19 = arith.constant 0 : index
    %c0_20 = arith.constant 0 : index
    %25 = vector.load %arg9[%c0_19, %c0_20] : memref<3x32xbf16, #tpu.memory_space<vmem>>, vector<3x32xbf16>
    %c0_21 = arith.constant 0 : index
    %c0_22 = arith.constant 0 : index
    %26 = vector.load %arg10[%c0_21, %c0_22] : memref<3x1xf32, #tpu.memory_space<vmem>>, vector<3x1xf32>
    %cst_23 = arith.constant dense<0.000000e+00> : vector<3x600xf32>
    %27 = tpu.matmul %25, %24, %cst_23 {dimension_numbers = #tpu.dot_dimension_numbers<[1], [0], [0], [1], [0, 0, 1, 1], [], []>} : vector<3x32xbf16>, vector<32x600xbf16>, vector<3x600xf32> -> vector<3x600xf32>
    %28 = vector.broadcast %26 : vector<3x1xf32> to vector<3x600xf32>
    %29 = arith.addf %27, %28 : vector<3x600xf32>
    %c0_24 = arith.constant 0 : index
    %c0_25 = arith.constant 0 : index
    %c0_26 = arith.constant 0 : index
    %30 = vector.load %arg11[%c0_24, %c0_25, %c0_26] : memref<1x3x600xf32, #tpu.memory_space<vmem>>, vector<1x3x600xf32>
    %31 = vector.shape_cast %30 : vector<1x3x600xf32> to vector<3x600xf32>
    %32 = vector.shape_cast %29 : vector<3x600xf32> to vector<1x3x600xf32>
    tpu.vector_store %arg11[%c0_24, %c0_25, %c0_26], %32 {strides = array<i32>} : memref<1x3x600xf32, #tpu.memory_space<vmem>>, vector<1x3x600xf32>,
    return
  }
  func.func @transform_0(%arg0: i32, %arg1: i32) -> (i32, i32, i32) {
    %c0_i32 = arith.constant 0 : i32
    %c0_i32_0 = arith.constant 0 : i32
    return %arg0, %c0_i32, %arg1 : i32, i32, i32
  }
  func.func @transform_1(%arg0: i32, %arg1: i32) -> (i32, i32, i32) {
    %c0_i32 = arith.constant 0 : i32
    %c0_i32_0 = arith.constant 0 : i32
    return %arg0, %c0_i32, %arg1 : i32, i32, i32
  }
  func.func @transform_2(%arg0: i32, %arg1: i32) -> (i32, i32) {
    %c0_i32 = arith.constant 0 : i32
    %c0_i32_0 = arith.constant 0 : i32
    %c0_i32_1 = arith.constant 0 : i32
    return %c0_i32, %c0_i32_0 : i32, i32
  }
  func.func @transform_3(%arg0: i32, %arg1: i32) -> (i32, i32) {
    %c0_i32 = arith.constant 0 : i32
    %c0_i32_0 = arith.constant 0 : i32
    %c0_i32_1 = arith.constant 0 : i32
    return %c0_i32, %c0_i32_0 : i32, i32
  }
  func.func @transform_4(%arg0: i32, %arg1: i32) -> (i32, i32) {
    %c0_i32 = arith.constant 0 : i32
    %c0_i32_0 = arith.constant 0 : i32
    %c0_i32_1 = arith.constant 0 : i32
    return %c0_i32, %c0_i32_0 : i32, i32
  }
  func.func @transform_5(%arg0: i32, %arg1: i32) -> (i32, i32) {
    %c0_i32 = arith.constant 0 : i32
    %c0_i32_0 = arith.constant 0 : i32
    %c0_i32_1 = arith.constant 0 : i32
    return %c0_i32, %c0_i32_0 : i32, i32
  }
  func.func @transform_6(%arg0: i32, %arg1: i32) -> (i32, i32) {
    %c0_i32 = arith.constant 0 : i32
    %c0_i32_0 = arith.constant 0 : i32
    %c0_i32_1 = arith.constant 0 : i32
    return %c0_i32, %c0_i32_0 : i32, i32
  }
  func.func @transform_7(%arg0: i32, %arg1: i32) -> (i32, i32) {
    %c0_i32 = arith.constant 0 : i32
    %c0_i32_0 = arith.constant 0 : i32
    %c0_i32_1 = arith.constant 0 : i32
    return %c0_i32, %c0_i32_0 : i32, i32
  }
  func.func @transform_8(%arg0: i32, %arg1: i32) -> (i32, i32) {
    %c0_i32 = arith.constant 0 : i32
    %c0_i32_0 = arith.constant 0 : i32
    %c0_i32_1 = arith.constant 0 : i32
    return %c0_i32, %c0_i32_0 : i32, i32
  }
  func.func @transform_9(%arg0: i32, %arg1: i32) -> (i32, i32, i32) {
    %c0_i32 = arith.constant 0 : i32
    %c0_i32_0 = arith.constant 0 : i32
    return %arg0, %c0_i32, %arg1 : i32, i32, i32
  }
}

</mosaic_0001>

<bundles_post_ra>
// kernel: tpu_custom_call.1
= control target key start
LH: loop header
LB: loop body
LE: loop exit
PB: predicated region body
PF: predicated region fallthrough
CT: control target
= control target key end

     0   :  { %s1620_s30 = smov 0   ;;  %s1622_s10 = smov 0   ;;  %s1804_s0 = inlined_call_operand.vmem [shape: f32[2,2,600], index: 0, kind: input, shape index: {}]   ;;  %s1805_s1 = inlined_call_operand.vmem [shape: f32[2,30,600], index: 1, kind: input, shape index: {}]   ;;  %s1806_s2 = inlined_call_operand.vmem [shape: bf16[32,2], index: 2, kind: input, shape index: {}]   ;;  %s1807_s3 = inlined_call_operand.vmem [shape: bf16[32,30], index: 3, kind: input, shape index: {}]   ;;  %s1808_s4 = inlined_call_operand.vmem [shape: f32[32,1], index: 4, kind: input, shape index: {}]   ;;  %s1809_s5 = inlined_call_operand.vmem [shape: bf16[32,32], index: 5, kind: input, shape index: {}]   ;;  %s1810_s6 = inlined_call_operand.vmem [shape: f32[32,1], index: 6, kind: input, shape index: {}]   ;;  %s1811_s7 = inlined_call_operand.vmem [shape: bf16[3,32], index: 7, kind: input, shape index: {}]   ;;  %s1812_s8 = inlined_call_operand.vmem [shape: f32[3,1], index: 8, kind: input, shape index: {}]   ;;  %s1813_s9 = inlined_call_operand.vmem [shape: f32[2,3,600], index: 9, kind: output, shape index: {}]  }
   0x1   :  { %s1624_s11 = smov 0  }
   0x2 LB: > { %s31_s12 = sadd.s32 1, %s1560_s10  ;;  %p1418_p0 = scmp.ge.s32.totalorder %s1564_s11, 1  ;;  %s1564_s11 = sphi %s1624_s11, %s19_s11   ;;  %s1560_s10 = sphi %s1622_s10, %s1815_s10   ;;  %s1556_s30 = sphi %s1620_s30, %s1814_s30  }
   0x3   : > { %p33_p1 = scmp.ge.s32.totalorder %s31_s12, 2  ;;  %p325_p2 = scmp.lt.s32.totalorder %s1564_s11, 3 }
   0x5   : > { %s1817_s12 = smov (%p33_p1, %s31_s12), 0  ;;  %p326_p3 = pnand %p1418_p0, %p325_p2 }
   0x6   : > { %p379_p4 = scmp.lt.s32.totalorder (!%p326_p3), %s1556_s30, 1 }
   0x7   : > { %329 = sbr.rel (%p326_p3) target bundleno = 697 (0x2b9), region = 56 }
   0xc   : > { %v1566_v0 = vmov 0   ;;  %s1819_s30 = smov (!%p379_p4, %s1556_s30), 1  ;;  %v417_v1 = vlaneseq  ;;  %v1567_v2 = vmov 1983009808   ;;  %v487_v4 = vld [vmem:[%s1808_s4 + $0x10] sm:$0xff]  ;;  %v488_v7 = vld [vmem:[%s1808_s4 + $0x18] sm:$0xff] }
   0xd   : > { %554 = vmatprep.mubr.bf16.mxu0 %v1566_v0  ;;  %607 = vmatprep.mubr.bf16.mxu1 %v1566_v0  ;;  %v415_v3 = vunpack.c.l.s4 %v1567_v2  ;;  %s1503_s13 = smul.u32 160, %s1819_s30  ;;  %v485_v8 = vld [vmem:[%s1808_s4] sm:$0xff]  ;;  %v486_v9 = vld [vmem:[%s1808_s4 + $0x8] sm:$0xff]  ;;  %vm506_vm0 = vcmask 1046528   ;;  %v941_v22 = vld [vmem:[%s1810_s6 + $0x10] sm:$0xff]  ;;  %vm499_vm1 = vcmask 244736  }
   0xe   : > { %1533 = vset.pattern.permute.xlu0 %v1566_v0  ;;  %1534 = vset.pattern.permute.xlu1 %v1566_v0  ;;  %s1502_s19 = smul.u32 10, %s1819_s30  ;;  %v418_v6 = vshrl.u32 %v417_v1, 7  ;;  %v1535_v40 = vld [vmem:[%s1807_s3] sm:$0xff]   ;;  %v942_v47 = vld [vmem:[%s1810_s6 + $0x18] sm:$0xff]  ;;  %v940_v49 = vld [vmem:[%s1810_s6 + $0x8] sm:$0xff]  ;;  %vm694_vm2 = vcmask 1040384  }
   0xf   : > { %s1651_s18 = scalar_lea.vmem %s1805_s1, %s1503_s13  ;;  %v416_v5 = vunpack.c.0.s8 %v415_v3  ;;  %877 = vperm.xlu0 %1533, %v487_v4   ;;  %867 = vperm.xlu1 %1534, %v485_v8   ;;  %v939_v48 = vld [vmem:[%s1810_s6] sm:$0xff]  ;;  %v1536_v62 = vld [vmem:[%s1807_s3 + $0x8] sm:$0xff]   ;;  %vm687_vm3 = vcmask 15360   ;;  %vm973_vm4 = vcmask 261120   ;;  %vm1569_vm5 = vmmov 0   ;;  %s1504_s20 = smul.u32 20, %s1819_s30 }
  0x10   : > { %v458_v10 = vld [vmem:[%s1651_s18 + $0x58] sm:$0xff]  ;;  %v463_v11 = vld [vmem:[%s1651_s18 + $0x80] sm:$0x3f]  ;;  %v460_v12 = vld [vmem:[%s1651_s18 + $0x68] sm:$0xff]  ;;  %s1682_s13 = scalar_lea.vmem %s1804_s0, %s1502_s19  ;;  %vm1307_vm6 = vcmask 714752  }
  0x11   : > { %v473_v13 = vpack.c.bf16 %v463_v11, %v458_v10  ;;  %v465_v14 = vld [vmem:[%s1651_s18 + $0x90] sm:$0x3f]  ;;  %v462_v16 = vld [vmem:[%s1651_s18 + $0x78] sm:$0x3f]  ;;  %v459_v19 = vld [vmem:[%s1651_s18 + $0x60] sm:$0xff]  ;;  %v419_v27 = vsub.s32 %v416_v5, %v418_v6 }
  0x12   : > { %v457_v15 = vld [vmem:[%s1651_s18 + $0x50] sm:$0xff]  ;;  %v475_v17 = vpack.c.bf16 %v465_v14, %v460_v12  ;;  %v464_v20 = vld [vmem:[%s1651_s18 + $0x88] sm:$0x3f]  ;;  %v450_v25 = vld [vmem:[%s1651_s18 + $0x18] sm:$0xff] }
  0x13   : > { %v472_v18 = vpack.c.bf16 %v462_v16, %v457_v15  ;;  %v448_v21 = vld [vmem:[%s1651_s18 + $0x8] sm:$0xff]  ;;  %1425 = vmatprep.subr.msk.bf16.mxu0 %vm506_vm0, %v473_v13  ;;  %v474_v23 = vpack.c.bf16 %v464_v20, %v459_v19  ;;  %v453_v24 = vld [vmem:[%s1651_s18 + $0x30] sm:$0xff]  ;;  %v455_v26 = vld [vmem:[%s1651_s18 + $0x40] sm:$0xff]  ;;  %882 = vperm.xlu0 %1533, %v488_v7  }
  0x14   : > { %1428 = vmatprep.subr.msk.bf16.mxu1 %vm506_vm0, %v475_v17  ;;  %v468_v29 = vpack.c.bf16 %v453_v24, %v448_v21  ;;  %v470_v30 = vpack.c.bf16 %v455_v26, %v450_v25  ;;  %v447_v31 = vld [vmem:[%s1651_s18] sm:$0xff]  ;;  %v452_v32 = vld [vmem:[%s1651_s18 + $0x28] sm:$0xff]  ;;  %v449_v33 = vld [vmem:[%s1651_s18 + $0x10] sm:$0xff]  ;;  %872 = vperm.xlu1 %1534, %v486_v9  }
  0x15   : > { %v508_v28 = vsel %vm506_vm0, %v472_v18, 0  ;;  %v514_v34 = vsel %vm506_vm0, %v474_v23, 0  ;;  %v467_v35 = vpack.c.bf16 %v452_v32, %v447_v31  ;;  %v454_v36 = vld [vmem:[%s1651_s18 + $0x38] sm:$0xff]  ;;  %v461_v37 = vld [vmem:[%s1651_s18 + $0x70] sm:$0xff]  ;;  %v409_v42 = vld [vmem:[%s1682_s13] sm:$0xff] }
  0x16   : > { %535 = vmatpush1.bf16.msra.mxu0 %v508_v28  ;;  %v466_v38 = vld [vmem:[%s1651_s18 + $0x98] sm:$0x3f]  ;;  %588 = vmatpush1.bf16.msra.mxu1 %v514_v34  ;;  %v469_v39 = vpack.c.bf16 %v454_v36, %v449_v33  ;;  %v420_v43 = vrot.slane %v409_v42, %v419_v27  ;;  %v451_v44 = vld [vmem:[%s1651_s18 + $0x20] sm:$0xff]  ;;  %v456_v45 = vld [vmem:[%s1651_s18 + $0x48] sm:$0xff]  ;;  %v413_v46 = vcombine.high %v409_v42, %v409_v42  ;;  %s406_s18 = scalar_lea.vmem %s1813_s9, %s1504_s20 }
  0x17   : > { %536 = vmatprep.subr.bf16.mxu0 %v468_v29  ;;  %v476_v41 = vpack.c.bf16 %v466_v38, %v461_v37  ;;  %589 = vmatprep.subr.bf16.mxu1 %v470_v30  ;;  %v1422_v53 = vld.sshfl [vmem:[%s1682_s13 + $0x8] sm:$0x3 pattern:$0x76325410]  ;;  %v471_v56 = vpack.c.bf16 %v456_v45, %v451_v44  ;;  %v1166_v60 = vld [vmem:[%s1812_s8] sm:$0x7] }
  0x18   : > { %955 = vperm.xlu0 %1533, %v941_v22   ;;  %960 = vperm.xlu1 %1534, %v942_v47   ;;  %v428_v50 = vcombine.high %v420_v43, %v420_v43  ;;  %v442_v51 = vpack.c.bf16 %v420_v43, %v420_v43  ;;  %v427_v52 = vrot.slane %v413_v46, %v419_v27  ;;  %v1537_v1 = vld [vmem:[%s1806_s2] sm:$0xff]   ;;  %v1539_v4 = vld [vmem:[%s1806_s2 + $0x8] sm:$0xff]  }
  0x19   : > { %v520_v54 = vsel %vm506_vm0, %v476_v41, 0  ;;  %v446_v59 = vpack.c.bf16 %v1422_v53, %v1422_v53 }
  0x1a   : > { %537 = vmatpush1.bf16.msra.mxu0 %v467_v35  ;;  %590 = vmatpush1.bf16.msra.mxu1 %v469_v39  ;;  %v443_v55 = vpack.c.bf16 %v428_v50, %v428_v50  ;;  %v429_v57 = vcombine.high %v427_v52, %v427_v52  ;;  %v696_v58 = vsel %vm694_vm2, %v442_v51, 0  ;;  %v444_v63 = vpack.c.bf16 %v427_v52, %v427_v52 }
  0x1b   : > { %1500 = vmatprep.subr.msk.bf16.mxu0 %vm506_vm0, %v476_v41  ;;  %v708_v3 = vsel %vm694_vm2, %v446_v59, 0 }
  0x1c   : > { %945 = vperm.xlu0 %1533, %v939_v48   ;;  %950 = vperm.xlu1 %1534, %v940_v49   ;;  %v445_v61 = vpack.c.bf16 %v429_v57, %v429_v57  ;;  %v702_v2 = vsel %vm694_vm2, %v444_v63, 0 }
  0x1d   : > { %1426 = vmatmul.mubr.msk.bf16.vlgmr.msra.gmra.mxu0 %vm499_vm1, %v1535_v40  ;;  %1429 = vmatmul.mubr.msk.bf16.vlgmr.msra.gmra.mxu1 %vm499_vm1, %v1535_v40 }
  0x1e   : > { %564 = vmatprep.mubr.bf16.mxu0 %v1566_v0  ;;  %617 = vmatprep.mubr.bf16.mxu1 %v1566_v0 }
  0x1f   : > { %1471 = vmatpush3.bf16.msra.mxu0 %v520_v54  ;;  %1435 = vmatprep.subr.msk.bf16.mxu1 %vm694_vm2, %v443_v55 }
  0x20   : > { %1472 = vmatprep.subr.bf16.mxu0 %v471_v56  ;;  %725 = vmatpush1.bf16.msra.mxu1 %v696_v58 }
  0x21   : > { %1169 = vperm.xlu0 %1533, %v1166_v60   ;;  %1501 = vmatprep.subr.msk.bf16.mxu1 %vm694_vm2, %v446_v59 }
  0x23   : > { %1473 = vmatpush3.bf16.msra.mxu0 %v471_v56 }
  0x24   : > { %1438 = vmatprep.subr.msk.bf16.mxu0 %vm694_vm2, %v445_v61 }
  0x25   : > { %1427 = vmatmul.mubr.msk.bf16.gmra.mxu0 %vm499_vm1, %v1536_v62  ;;  %1430 = vmatmul.mubr.msk.bf16.gmra.mxu1 %vm499_vm1, %v1536_v62 }
  0x26   : > { %1474 = vmatprep.mubr.msk.bf16.mxu0 %vm499_vm1, %v1535_v40  ;;  %742 = vmatprep.mubr.bf16.mxu1 %v1566_v0 }
  0x2d   : > { %1475 = vmatmul.mubr.msk.bf16.vlgmr.msra.gmra.mxu0 %vm499_vm1, %v1536_v62  ;;  %1436 = vmatmul.mubr.msk.bf16.vlgmr.msra.gmra.mxu1 %vm687_vm3, %v1537_v1 }
  0x2e   : > { %778 = vmatpush1.bf16.msra.mxu0 %v702_v2  ;;  %752 = vmatprep.mubr.bf16.mxu1 %v1566_v0 }
  0x2f   : > { %795 = vmatprep.mubr.bf16.mxu0 %v1566_v0  ;;  %1479 = vmatpush3.bf16.msra.mxu1 %v708_v3 }
  0x35   : > { %1439 = vmatmul.mubr.msk.bf16.vlgmr.msra.gmra.mxu0 %vm687_vm3, %v1537_v1  ;;  %1437 = vmatmul.mubr.msk.bf16.gmra.mxu1 %vm687_vm3, %v1539_v4 }
  0x36   : > { %805 = vmatprep.mubr.bf16.mxu0 %v1566_v0  ;;  %1480 = vmatprep.mubr.msk.bf16.mxu1 %vm687_vm3, %v1537_v1 }
  0x3d   : > { %1440 = vmatmul.mubr.msk.bf16.gmra.mxu0 %vm687_vm3, %v1539_v4  ;;  %1481 = vmatmul.mubr.msk.bf16.vlgmr.msra.gmra.mxu1 %vm687_vm3, %v1539_v4 }
  0x3e   : > { %1012 = vmatprep.mubr.bf16.mxu0 %v1566_v0  ;;  %1065 = vmatprep.mubr.bf16.mxu1 %v1566_v0 }
  0x8a   : > { %v1747_v27 = vpop.permute.xlu1 %867  ;;  %v878_v31 = vpop.permute.xlu0 %877 }
  0x8e   : > { %v883_v48 = vpop.permute.xlu0 %882 }
  0x8f   : > { %v1751_v38 = vpop.permute.xlu1 %872 }
  0xdd   : > { %v556_v5 = vpop.f32.mrf.mxu0  ;;  %v609_v6 = vpop.f32.mrf.mxu1 }
  0xdf   : > { %v558_v7 = vpop.f32.mrf.mxu0  ;;  %v611_v8 = vpop.f32.mrf.mxu1 }
  0xe1   : > { %v560_v9 = vpop.f32.mrf.mxu0  ;;  %v1743_v10 = vpop.f32.mrf.mxu1 }
  0xe3   : > { %v562_v11 = vpop.f32.mrf.mxu0  ;;  %v615_v12 = vpop.f32.mrf.mxu1 }
  0xe5   : > { %v566_v13 = vpop.f32.mrf.mxu0  ;;  %v619_v14 = vpop.f32.mrf.mxu1 }
  0xe7   : > { %v568_v15 = vpop.f32.mrf.mxu0  ;;  %v621_v16 = vpop.f32.mrf.mxu1 }
  0xe9   : > { %v570_v17 = vpop.f32.mrf.mxu0  ;;  %v623_v18 = vpop.f32.mrf.mxu1 }
  0xeb   : > { %v572_v19 = vpop.f32.mrf.mxu0  ;;  %v1745_v20 = vpop.f32.mrf.mxu1 }
  0xed   : > { %v1476_v21 = vpop.f32.mrf.mxu0  ;;  %v744_v22 = vpop.f32.mrf.mxu1 }
  0xee   : > { %v745_v32 = vadd.f32 %v744_v22, %v556_v5 }
  0xef   : > { %v662_v23 = vpop.f32.mrf.mxu0  ;;  %v746_v24 = vpop.f32.mrf.mxu1 }
  0xf0   : > { %v747_v33 = vadd.f32 %v746_v24, %v558_v7  ;;  %v1754_v42 = vadd.f32 %v1747_v27, %v745_v32 }
  0xf1   : > { %v1477_v25 = vpop.f32.mrf.mxu0  ;;  %v748_v26 = vpop.f32.mrf.mxu1 }
  0xf2   : > { %v749_v36 = vadd.f32 %v748_v26, %v560_v9  ;;  %v886_v43 = vadd.f32 %v1747_v27, %v747_v33  ;;  %v905_v56 = vmax.f32 %v1754_v42, 0.0 }
  0xf3   : > { %v1749_v28 = vpop.f32.mrf.mxu0  ;;  %v750_v29 = vpop.f32.mrf.mxu1 }
  0xf4   : > { %v751_v39 = vadd.f32 %v750_v29, %v562_v11  ;;  %v890_v49 = vadd.f32 %v1751_v38, %v749_v36  ;;  %v906_v57 = vmax.f32 %v886_v43, 0.0 }
  0xf5   : > { %v797_v30 = vpop.f32.mrf.mxu0  ;;  %v754_v34 = vpop.f32.mrf.mxu1 }
  0xf6   : > { %v755_v44 = vadd.f32 %v754_v34, %v566_v13  ;;  %v891_v51 = vadd.f32 %v1751_v38, %v751_v39  ;;  %v798_v60 = vadd.f32 %v797_v30, %v609_v6  ;;  %v910_v2 = vmax.f32 %v890_v49, 0.0 }
  0xf7   : > { %v799_v35 = vpop.f32.mrf.mxu0  ;;  %v756_v37 = vpop.f32.mrf.mxu1 }
  0xf8   : > { %v757_v40 = vadd.f32 %v756_v37, %v568_v15  ;;  %v895_v58 = vadd.f32 %v878_v31, %v755_v44  ;;  %v800_v3 = vadd.f32 %v799_v35, %v611_v8  ;;  %v911_v9 = vmax.f32 %v891_v51, 0.0 }
  0xf9   : > { %v801_v41 = vpop.f32.mrf.mxu0  ;;  %v758_v45 = vpop.f32.mrf.mxu1 }
  0xfa   : > { %v759_v46 = vadd.f32 %v758_v45, %v570_v17  ;;  %v896_v52 = vadd.f32 %v878_v31, %v757_v40  ;;  %v802_v22 = vadd.f32 %v801_v41, %v1743_v10  ;;  %v926_v10 = vpack.c.bf16 %v911_v9, %v906_v57  ;;  %v1541_v57 = vld [vmem:[%s1809_s5 + $0x8] sm:$0xff]  }
  0xfb   : > { %v803_v47 = vpop.f32.mrf.mxu0  ;;  %v760_v50 = vpop.f32.mrf.mxu1  ;;  %v887_v45 = vadd.f32 %v1747_v27, %v798_v60 }
  0xfc   : > { %v900_v53 = vadd.f32 %v883_v48, %v759_v46  ;;  %v761_v54 = vadd.f32 %v760_v50, %v572_v19  ;;  %v804_v62 = vadd.f32 %v803_v47, %v615_v12  ;;  %v916_v11 = vmax.f32 %v896_v52, 0.0 }
  0xfd   : > { %v807_v55 = vpop.f32.mrf.mxu0  ;;  %v1482_v59 = vpop.f32.mrf.mxu1  ;;  %v915_v19 = vmax.f32 %v895_v58, 0.0  ;;  %v892_v39 = vadd.f32 %v1751_v38, %v802_v22 }
  0xfe   : > { %v901_v61 = vadd.f32 %v883_v48, %v761_v54  ;;  %v859_v63 = vadd.f32 %v1482_v59, %v1476_v21  ;;  %v920_v4 = vmax.f32 %v900_v53, 0.0  ;;  %v808_v15 = vadd.f32 %v807_v55, %v619_v14 }
  0xff   : > { %v809_v1 = vpop.f32.mrf.mxu0  ;;  %v850_v7 = vpop.f32.mrf.mxu1  ;;  %v893_v12 = vadd.f32 %v1751_v38, %v804_v62  ;;  %v912_v52 = vmax.f32 %v892_v39, 0.0  ;;  %v907_v55 = vmax.f32 %v887_v45, 0.0 }
 0x100   : > { %v810_v5 = vadd.f32 %v809_v1, %v621_v16  ;;  %v921_v13 = vmax.f32 %v901_v61, 0.0  ;;  %v899_v24 = vadd.f32 %v878_v31, %v859_v63  ;;  %v851_v21 = vadd.f32 %v850_v7, %v662_v23  ;;  %v961_v61 = vpop.permute.xlu1 %960  ;;  %v956_v1 = vpop.permute.xlu0 %955 }
 0x101   : > { %v811_v17 = vpop.f32.mrf.mxu0  ;;  %v1483_v6 = vpop.f32.mrf.mxu1  ;;  %v930_v32 = vpack.c.bf16 %v920_v4, %v915_v19  ;;  %v897_v14 = vadd.f32 %v878_v31, %v808_v15 }
 0x102   : > { %v812_v26 = vadd.f32 %v811_v17, %v623_v18  ;;  %v862_v29 = vadd.f32 %v1483_v6, %v1477_v25  ;;  %v931_v8 = vpack.c.bf16 %v921_v13, %v916_v11  ;;  %v898_v16 = vadd.f32 %v878_v31, %v810_v5 }
 0x103   : > { %v813_v30 = vpop.f32.mrf.mxu0  ;;  %v853_v35 = vpop.f32.mrf.mxu1  ;;  %v888_v18 = vadd.f32 %v1747_v27, %v800_v3  ;;  %v919_v23 = vmax.f32 %v899_v24, 0.0  ;;  %v889_v40 = vadd.f32 %v1747_v27, %v851_v21  ;;  %v913_v31 = vmax.f32 %v893_v12, 0.0 }
 0x104   : > { %v902_v33 = vadd.f32 %v883_v48, %v812_v26  ;;  %v814_v34 = vadd.f32 %v813_v30, %v1745_v20  ;;  %v904_v36 = vadd.f32 %v883_v48, %v862_v29  ;;  %v854_v37 = vadd.f32 %v853_v35, %v1749_v28  ;;  %992 = vmatprep.subr.bf16.mxu0 %v931_v8  ;;  %v951_v7 = vpop.permute.xlu1 %950  ;;  %v946_v19 = vpop.permute.xlu0 %945 }
 0x105   : > { %993 = vmatpush1.bf16.msra.mxu0 %v930_v32  ;;  %v918_v43 = vmax.f32 %v898_v16, 0.0  ;;  %v925_v28 = vpack.c.bf16 %v910_v2, %v905_v56  ;;  %v917_v46 = vmax.f32 %v897_v14, 0.0  ;;  %v908_v50 = vmax.f32 %v888_v18, 0.0 }
 0x106   : > { %v903_v25 = vadd.f32 %v883_v48, %v814_v34  ;;  %v922_v41 = vmax.f32 %v902_v33, 0.0  ;;  %v924_v42 = vmax.f32 %v904_v36, 0.0  ;;  %v894_v20 = vadd.f32 %v1751_v38, %v854_v37  ;;  %994 = vmatprep.subr.bf16.mxu0 %v926_v10  ;;  %v1540_v48 = vld [vmem:[%s1809_s5] sm:$0xff]  }
 0x107   : > { %v909_v38 = vmax.f32 %v889_v40, 0.0  ;;  %v928_v54 = vpack.c.bf16 %v913_v31, %v908_v50  ;;  %v927_v56 = vpack.c.bf16 %v912_v52, %v907_v55 }
 0x108   : > { %v923_v44 = vmax.f32 %v903_v25, 0.0  ;;  %v914_v47 = vmax.f32 %v894_v20, 0.0  ;;  %v934_v49 = vpack.c.bf16 %v924_v42, %v919_v23  ;;  %v932_v53 = vpack.c.bf16 %v922_v41, %v917_v46 }
 0x109   : > { %995 = vmatpush1.bf16.msra.mxu0 %v925_v28 }
 0x10a   : > { %v933_v51 = vpack.c.bf16 %v923_v44, %v918_v43  ;;  %1484 = vmatprep.subr.bf16.mxu0 %v934_v49  ;;  %v929_v27 = vpack.c.bf16 %v914_v47, %v909_v38 }
 0x10c   : > { %1045 = vmatprep.subr.bf16.mxu1 %v933_v51  ;;  %1445 = vmatmul.mubr.msk.bf16.vlgmr.msra.gmra.mxu0 %vm973_vm4, %v1540_v48 }
 0x10d   : > { %1046 = vmatpush1.bf16.msra.mxu1 %v932_v53  ;;  %1485 = vmatpush3.bf16.msra.mxu0 %v934_v49 }
 0x10e   : > { %1047 = vmatprep.subr.bf16.mxu1 %v928_v54  ;;  %1486 = vmatprep.subr.bf16.mxu0 %v929_v27 }
 0x10f   : > { %1022 = vmatprep.mubr.bf16.mxu0 %v1566_v0 }
 0x111   : > { %1048 = vmatpush1.bf16.msra.mxu1 %v927_v56  ;;  %1487 = vmatpush3.bf16.msra.mxu0 %v929_v27 }
 0x114   : > { %1447 = vmatmul.mubr.msk.bf16.vlgmr.msra.gmra.mxu1 %vm973_vm4, %v1540_v48  ;;  %1446 = vmatmul.mubr.msk.bf16.gmra.mxu0 %vm973_vm4, %v1541_v57 }
 0x115   : > { %1075 = vmatprep.mubr.bf16.mxu1 %v1566_v0  ;;  %1488 = vmatprep.mubr.msk.bf16.mxu0 %vm973_vm4, %v1540_v48 }
 0x11c   : > { %1448 = vmatmul.mubr.msk.bf16.gmra.mxu1 %vm973_vm4, %v1541_v57  ;;  %1489 = vmatmul.mubr.msk.bf16.vlgmr.msra.gmra.mxu0 %vm973_vm4, %v1541_v57 }
 0x11d   : > { %1207 = vmatprep.mubr.bf16.mxu1 %v1566_v0  ;;  %1248 = vmatprep.mubr.bf16.mxu0 %v1566_v0 }
 0x1cc   : > { %v1014_v58 = vpop.f32.mrf.mxu0 }
 0x1cd   : > { %v1015_v30 = vadd.f32 %v1014_v58, %v946_v19 }
 0x1ce   : > { %v1016_v59 = vpop.f32.mrf.mxu0 }
 0x1cf   : > { %v1017_v24 = vadd.f32 %v1016_v59, %v946_v19  ;;  %v1135_v41 = vmax.f32 %v1015_v30, 0.0  ;;  %v1165_v59 = vld [vmem:[%s1811_s7] sm:$0x3] }
 0x1d0   : > { %v1018_v60 = vpop.f32.mrf.mxu0 }
 0x1d1   : > { %v1019_v26 = vadd.f32 %v1018_v60, %v951_v7  ;;  %v1136_v14 = vmax.f32 %v1017_v24, 0.0 }
 0x1d2   : > { %v1020_v62 = vpop.f32.mrf.mxu0 }
 0x1d3   : > { %v1021_v11 = vadd.f32 %v1020_v62, %v951_v7  ;;  %v1140_v36 = vmax.f32 %v1019_v26, 0.0  ;;  %v1568_v62 = vmov 0.0  }
 0x1d4   : > { %v1067_v63 = vpop.f32.mrf.mxu1  ;;  %v1024_v2 = vpop.f32.mrf.mxu0 }
 0x1d5   : > { %v1025_v22 = vadd.f32 %v1024_v2, %v956_v1  ;;  %v1141_v8 = vmax.f32 %v1021_v11, 0.0  ;;  %v1155_v47 = vpack.c.bf16 %v1140_v36, %v1135_v41  ;;  %v1068_v54 = vadd.f32 %v1067_v63, %v946_v19  ;;  %v1170_v11 = vpop.permute.xlu0 %1169 }
 0x1d6   : > { %v1069_v3 = vpop.f32.mrf.mxu1  ;;  %v1026_v4 = vpop.f32.mrf.mxu0 }
 0x1d7   : > { %v1027_v13 = vadd.f32 %v1026_v4, %v956_v1  ;;  %v1145_v34 = vmax.f32 %v1025_v22, 0.0  ;;  %v1156_v42 = vpack.c.bf16 %v1141_v8, %v1136_v14  ;;  %v1070_v44 = vadd.f32 %v1069_v3, %v946_v19 }
 0x1d8   : > { %v1071_v5 = vpop.f32.mrf.mxu1  ;;  %v1028_v9 = vpop.f32.mrf.mxu0  ;;  %v1137_v4 = vmax.f32 %v1068_v54, 0.0 }
 0x1d9   : > { %v1029_v15 = vadd.f32 %v1028_v9, %v961_v61  ;;  %v1146_v32 = vmax.f32 %v1027_v13, 0.0  ;;  %v1072_v49 = vadd.f32 %v1071_v5, %v951_v7  ;;  %v1138_v27 = vmax.f32 %v1070_v44, 0.0 }
 0x1da   : > { %v1073_v17 = vpop.f32.mrf.mxu1  ;;  %v1030_v0 = vpop.f32.mrf.mxu0 }
 0x1db   : > { %v1031_v6 = vadd.f32 %v1030_v0, %v961_v61  ;;  %v1150_v21 = vmax.f32 %v1029_v15, 0.0  ;;  %v1074_v10 = vadd.f32 %v1073_v17, %v951_v7  ;;  %v1142_v60 = vmax.f32 %v1072_v49, 0.0 }
 0x1dc   : > { %v1077_v12 = vpop.f32.mrf.mxu1  ;;  %v1490_v29 = vpop.f32.mrf.mxu0 }
 0x1dd   : > { %v1151_v16 = vmax.f32 %v1031_v6, 0.0  ;;  %v1160_v39 = vpack.c.bf16 %v1150_v21, %v1145_v34  ;;  %v1078_v20 = vadd.f32 %v1077_v12, %v956_v1  ;;  %v1129_v28 = vadd.f32 %v1490_v29, %v956_v1 }
 0x1de   : > { %v1079_v33 = vpop.f32.mrf.mxu1  ;;  %v1120_v35 = vpop.f32.mrf.mxu0  ;;  %v1143_v48 = vmax.f32 %v1074_v10, 0.0  ;;  %v1157_v5 = vpack.c.bf16 %v1142_v60, %v1137_v4 }
 0x1df   : > { %v1161_v37 = vpack.c.bf16 %v1151_v16, %v1146_v32  ;;  %v1080_v23 = vadd.f32 %v1079_v33, %v956_v1  ;;  %v1147_v55 = vmax.f32 %v1078_v20, 0.0  ;;  %v1149_v56 = vmax.f32 %v1129_v28, 0.0 }
 0x1e0   : > { %v1081_v18 = vpop.f32.mrf.mxu1  ;;  %v1491_v40 = vpop.f32.mrf.mxu0  ;;  %v1121_v57 = vadd.f32 %v1120_v35, %v946_v19  ;;  %v1158_v1 = vpack.c.bf16 %v1143_v48, %v1138_v27 }
 0x1e1   : > { %v1082_v25 = vadd.f32 %v1081_v18, %v961_v61  ;;  %v1132_v31 = vadd.f32 %v1491_v40, %v961_v61  ;;  %1187 = vmatprep.subr.bf16.mxu1 %v1161_v37  ;;  %v1148_v51 = vmax.f32 %v1080_v23, 0.0 }
 0x1e2   : > { %v1083_v43 = vpop.f32.mrf.mxu1  ;;  %v1123_v46 = vpop.f32.mrf.mxu0  ;;  %1188 = vmatpush1.bf16.msra.mxu1 %v1160_v39  ;;  %v1139_v63 = vmax.f32 %v1121_v57, 0.0 }
 0x1e3   : > { %v1084_v45 = vadd.f32 %v1083_v43, %v961_v61  ;;  %v1152_v50 = vmax.f32 %v1082_v25, 0.0  ;;  %1189 = vmatprep.subr.bf16.mxu1 %v1156_v42  ;;  %v1154_v52 = vmax.f32 %v1132_v31, 0.0  ;;  %v1124_v53 = vadd.f32 %v1123_v46, %v951_v7 }
 0x1e5   : > { %v1153_v38 = vmax.f32 %v1084_v45, 0.0  ;;  %v1162_v61 = vpack.c.bf16 %v1152_v50, %v1147_v55  ;;  %v1164_v2 = vpack.c.bf16 %v1154_v52, %v1149_v56  ;;  %v1144_v3 = vmax.f32 %v1124_v53, 0.0 }
 0x1e6   : > { %1190 = vmatpush1.bf16.msra.mxu1 %v1155_v47 }
 0x1e7   : > { %v1163_v58 = vpack.c.bf16 %v1153_v38, %v1148_v51  ;;  %1492 = vmatprep.subr.bf16.mxu1 %v1568_v62  ;;  %v1159_v7 = vpack.c.bf16 %v1144_v3, %v1139_v63 }
 0x1e9   : > { %1228 = vmatprep.subr.bf16.mxu0 %v1163_v58  ;;  %1451 = vmatmul.mubr.msk.bf16.vlgmr.msra.gmra.mxu1 %vm973_vm4, %v1165_v59 }
 0x1ea   : > { %1229 = vmatpush1.bf16.msra.mxu0 %v1162_v61  ;;  %1493 = vmatpush3.bf16.msra.mxu1 %v1164_v2 }
 0x1eb   : > { %1230 = vmatprep.subr.bf16.mxu0 %v1158_v1  ;;  %1494 = vmatprep.subr.bf16.mxu1 %v1568_v62 }
 0x1ec   : > { %1496 = vmatprep.mubr.msk.bf16.mxu1 %vm1569_vm5, %v1568_v62 }
 0x1ee   : > { %1231 = vmatpush1.bf16.msra.mxu0 %v1157_v5  ;;  %1495 = vmatpush3.bf16.msra.mxu1 %v1159_v7 }
 0x1f1   : > { %1452 = vmatmul.mubr.msk.bf16.vlgmr.msra.gmra.mxu0 %vm973_vm4, %v1165_v59  ;;  %1497 = vmatmul.mubr.msk.bf16.vlgmr.msra.gmra.mxu1 %vm973_vm4, %v1165_v59 }
 0x2a9   : > { %v1209_v9 = vpop.f32.mrf.mxu1 }
 0x2aa   : > { %v1210_v15 = vadd.f32 %v1209_v9, %v1170_v11 }
 0x2ab   : > { %v1211_v13 = vpop.f32.mrf.mxu1 }
 0x2ac   : > { %v1212_v17 = vadd.f32 %v1211_v13, %v1170_v11 }
 0x2ad   : > { %v1213_v19 = vpop.f32.mrf.mxu1 }
 0x2ae   : > { %v1301_v22 = vcombine.low %v1210_v15, %v1212_v17 }
 0x2af   : > { %v1214_v0 = vpop.f32.mrf.mxu1 }
 0x2b0   : > { %1305 = vst [vmem:[%s406_s18] sm:$0x77] %v1301_v22 }
 0x2b1   : > { %v1250_v24 = vpop.f32.mrf.mxu0  ;;  %v1291_v26 = vpop.f32.mrf.mxu1 }
 0x2b2   : > { %v1292_v6 = vadd.f32 %v1291_v26, %v1170_v11  ;;  %v1251_v21 = vadd.f32 %v1250_v24, %v1170_v11 }
 0x2b3   : > { %v1252_v12 = vpop.f32.mrf.mxu0  ;;  %v1498_v30 = vpop.f32.mrf.mxu1 }
 0x2b4   : > { %v1253_v29 = vadd.f32 %v1252_v12, %v1170_v11  ;;  %1308 = vst.msk [vmem:[%s406_s18 + $0x10] sm:$0x7] %vm1307_vm6, %v1292_v6 }
 0x2b5   : > { %v1254_v8 = vpop.f32.mrf.mxu0  ;;  %v1294_v16 = vpop.f32.mrf.mxu1 }
 0x2b6   : > { %v1302_v32 = vcombine.low %v1251_v21, %v1253_v29 }
 0x2b7   : > { %v1255_v33 = vpop.f32.mrf.mxu0  ;;  %v1499_v34 = vpop.f32.mrf.mxu1 }
 0x2b8   : > { %1306 = vst [vmem:[%s406_s18 + $0x8] sm:$0x77] %v1302_v32 }
 0x2b9 PF: > { %s19_s11 = sadd.s32 1, %s1564_s11   ;;  %s1814_s30 = smov %s1560_s10 }
 0x2ba   : > { %p16_p5 = scmp.ge.s32.totalorder %s19_s11, 4   ;;  %s1815_s10 = smov %s1817_s12 }
 0x2bc   :  { %18 = sbr.rel (!%p16_p5) target bundleno = 2 (0x2), region = 89 }

</bundles_post_ra>
